<compile_context>
chip_gen: v6e
topology: v6e:2x2x1
jax: 0.10.0
libtpu: 0.0.40
codegen_flags: <defaults>
</compile_context>

<pallas_src>
import functools
from typing import NamedTuple

import jax
import jax.numpy as jnp
from jax.experimental import pallas as pl
from jax.experimental.pallas import tpu as pltpu

LANE = 128     # TPU vreg lane width
SUBLANE = 8    # TPU f32 vreg sublane count


class Layout(NamedTuple):
    """Static (hashable) layout constants for the packed parameter slab."""
    c: int          # num_classes
    two_c: int      # 2 * num_classes
    c_number: int   # output classes
    padded_n: int   # lane-dense padded output width (>= 128)
    width: int      # slab lane width
    r_w1a: int      # row offset of W1.T[:C, :]   (multiplies FDx)
    r_w1b: int      # row offset of W1.T[C:, :]   (multiplies PDx)
    r_b1: int       # row offset of b1
    r_w2: int       # row offset of W2.T (lane-padded)
    r_b2: int       # row offset of b2   (lane-padded)
    rows: int       # total slab rows


def _round_up(x, m):
    return ((x + m - 1) // m) * m


def make_layout(num_classes=10, c_number=3):
    c = num_classes
    two_c = 2 * num_classes
    padded_n = _round_up(max(c_number, 1), LANE)
    width = max(padded_n, _round_up(two_c, LANE))
    r_w1a = 0
    r_w1b = r_w1a + _round_up(c, SUBLANE)
    r_b1 = r_w1b + _round_up(c, SUBLANE)
    r_w2 = r_b1 + SUBLANE
    r_b2 = r_w2 + _round_up(two_c, SUBLANE)
    rows = r_b2 + SUBLANE
    return Layout(c, two_c, c_number, padded_n, width,
                  r_w1a, r_w1b, r_b1, r_w2, r_b2, rows)


def prepare_params(params, layout):
    """One-time packing of PyTorch-layout Linear params into a single slab.

    Weights are transposed to (in, out), W1.T is split into its FDx/PDx
    halves (folds the concat into the kernel), W2.T / b2 are zero-padded to a
    lane-dense width, and everything is placed at 8-row-aligned offsets in one
    (rows, width) f32 array.  Call once; reuse across forward calls.
    """
    L = layout
    W1 = jnp.asarray(params["W1"], jnp.float32)    # (2C, 2C)  torch (out, in)
    b1 = jnp.asarray(params["b1"], jnp.float32)    # (2C,)
    W2 = jnp.asarray(params["W2"], jnp.float32)    # (C_Number, 2C)
    b2 = jnp.asarray(params["b2"], jnp.float32)    # (C_Number,)

    W1_t = W1.T                                    # (2C, 2C): x @ W1_t == x @ W1.T
    W1a = W1_t[:L.c, :]                            # (C, 2C): rows hit by FDx
    W1b = W1_t[L.c:, :]                            # (C, 2C): rows hit by PDx
    W2_t = W2.T                                    # (2C, C_Number)

    slab = jnp.zeros((L.rows, L.width), jnp.float32)
    slab = slab.at[L.r_w1a:L.r_w1a + L.c, :L.two_c].set(W1a)
    slab = slab.at[L.r_w1b:L.r_w1b + L.c, :L.two_c].set(W1b)
    slab = slab.at[L.r_b1, :L.two_c].set(b1)
    slab = slab.at[L.r_w2:L.r_w2 + L.two_c, :L.c_number].set(W2_t)
    slab = slab.at[L.r_b2, :L.c_number].set(b2)
    return slab


def dual_cifar4_kernel(fdx_ref, pdx_ref, p_ref, out_ref, *, layout):
    L = layout
    # Static carve-outs from the packed parameter slab.
    w1a = p_ref[L.r_w1a:L.r_w1a + L.c, :L.two_c]          # (C, 2C)
    w1b = p_ref[L.r_w1b:L.r_w1b + L.c, :L.two_c]          # (C, 2C)
    b1 = p_ref[L.r_b1:L.r_b1 + 1, :L.two_c]               # (1, 2C)
    w2 = p_ref[L.r_w2:L.r_w2 + L.two_c, :L.padded_n]      # (2C, padded_n)
    b2 = p_ref[L.r_b2:L.r_b2 + 1, :L.padded_n]            # (1, padded_n)

    # Linear1 with the concat folded in: cat(FDx,PDx) @ W1.T == FDx@W1a + PDx@W1b.
    h = (jnp.dot(fdx_ref[...], w1a, preferred_element_type=jnp.float32)
         + jnp.dot(pdx_ref[...], w1b, preferred_element_type=jnp.float32)
         + b1)
    h = jnp.maximum(h, 0.0)                                # ReLU (VPU)
    # Linear: 2C -> padded C_Number (lane-dense, unmasked full-width store).
    o = jnp.dot(h, w2, preferred_element_type=jnp.float32) + b2
    out_ref[...] = o.astype(out_ref.dtype)


@functools.partial(jax.jit, static_argnames=("layout",))
def dual_cifar4_forward(FDx, PDx, slab, layout):
    """FDx, PDx: (B, num_classes) f32; slab from prepare_params. -> (B, C_Number)."""
    B = FDx.shape[0]
    kernel = functools.partial(dual_cifar4_kernel, layout=layout)
    out_padded = pl.pallas_call(
        kernel,
        out_shape=jax.ShapeDtypeStruct((B, layout.padded_n), FDx.dtype),
        # Tiny problem: single block, everything resident in VMEM, no grid.
        in_specs=[pl.BlockSpec(memory_space=pltpu.MemorySpace.VMEM)] * 3,
        out_specs=pl.BlockSpec(memory_space=pltpu.MemorySpace.VMEM),
    )(FDx, PDx, slab)
    # Static un-pad: fused into this same jitted executable (no extra dispatch).
    return out_padded[:, :layout.c_number]


def init_params(key, num_classes=10, c_number=3, dtype=jnp.float32):
    """Deterministic synthetic init matching nn.Linear shapes."""
    k1, k2, k3, k4 = jax.random.split(key, 4)
    two_c = 2 * num_classes
    bound1 = 1.0 / jnp.sqrt(two_c)
    return {
        "W1": jax.random.uniform(k1, (two_c, two_c), dtype, -bound1, bound1),
        "b1": jax.random.uniform(k2, (two_c,), dtype, -bound1, bound1),
        "W2": jax.random.uniform(k3, (c_number, two_c), dtype, -bound1, bound1),
        "b2": jax.random.uniform(k4, (c_number,), dtype, -bound1, bound1),
    }


if __name__ == "__main__":
    num_classes = 10
    c_number = 3
    batch = 8

    key = jax.random.PRNGKey(0)
    kp, kf, kpd = jax.random.split(key, 3)
    params = init_params(kp, num_classes, c_number)

    # One-time layout + weight packing (hoisted out of the per-call hot path).
    layout = make_layout(num_classes, c_number)
    slab = prepare_params(params, layout)

    FDx = jax.random.normal(kf, (batch, num_classes), jnp.float32)
    PDx = jax.random.normal(kpd, (batch, num_classes), jnp.float32)

    out = dual_cifar4_forward(FDx, PDx, slab, layout=layout)
    out = jax.block_until_ready(out)

    # Pure-JAX reference check (same math as the PyTorch module).
    x = jnp.concatenate([FDx, PDx], axis=1)
    h = jnp.maximum(x @ params["W1"].T + params["b1"], 0.0)
    ref = h @ params["W2"].T + params["b2"]
    assert out.shape == (batch, c_number)
    assert jnp.allclose(out, ref, atol=1e-5, rtol=1e-5)

    print("KERNEL_OK")
</pallas_src>

<mosaic_0001>
module attributes {stable_mosaic.version = 11 : i64} {
  func.func @dual_cifar4_kernel(%arg0: memref<8x10xf32, #tpu.memory_space<vmem>>, %arg1: memref<8x10xf32, #tpu.memory_space<vmem>>, %arg2: memref<72x128xf32, #tpu.memory_space<vmem>>, %arg3: memref<8x128xf32, #tpu.memory_space<vmem>>) attributes {dimension_semantics = [], scalar_prefetch = 0 : i64, scratch_operands = 0 : i64, tpu.core_type = #tpu.core_type<tc>} {
    %c0 = arith.constant 0 : index
    %c0_0 = arith.constant 0 : index
    %0 = vector.load %arg2[%c0, %c0_0] : memref<72x128xf32, #tpu.memory_space<vmem>>, vector<10x20xf32>
    %c16 = arith.constant 16 : index
    %c0_1 = arith.constant 0 : index
    %1 = vector.load %arg2[%c16, %c0_1] : memref<72x128xf32, #tpu.memory_space<vmem>>, vector<10x20xf32>
    %c32 = arith.constant 32 : index
    %c0_2 = arith.constant 0 : index
    %2 = vector.load %arg2[%c32, %c0_2] : memref<72x128xf32, #tpu.memory_space<vmem>>, vector<1x20xf32>
    %c40 = arith.constant 40 : index
    %c0_3 = arith.constant 0 : index
    %3 = vector.load %arg2[%c40, %c0_3] : memref<72x128xf32, #tpu.memory_space<vmem>>, vector<20x128xf32>
    %c64 = arith.constant 64 : index
    %c0_4 = arith.constant 0 : index
    %4 = vector.load %arg2[%c64, %c0_4] : memref<72x128xf32, #tpu.memory_space<vmem>>, vector<1x128xf32>
    %c0_5 = arith.constant 0 : index
    %c0_6 = arith.constant 0 : index
    %5 = vector.load %arg0[%c0_5, %c0_6] : memref<8x10xf32, #tpu.memory_space<vmem>>, vector<8x10xf32>
    %cst = arith.constant dense<0.000000e+00> : vector<8x20xf32>
    %6 = tpu.matmul %5, %0, %cst {dimension_numbers = #tpu.dot_dimension_numbers<[1], [0], [0], [1], [0, 0, 1, 1], [], []>} : vector<8x10xf32>, vector<10x20xf32>, vector<8x20xf32> -> vector<8x20xf32>
    %c0_7 = arith.constant 0 : index
    %c0_8 = arith.constant 0 : index
    %7 = vector.load %arg1[%c0_7, %c0_8] : memref<8x10xf32, #tpu.memory_space<vmem>>, vector<8x10xf32>
    %cst_9 = arith.constant dense<0.000000e+00> : vector<8x20xf32>
    %8 = tpu.matmul %7, %1, %cst_9 {dimension_numbers = #tpu.dot_dimension_numbers<[1], [0], [0], [1], [0, 0, 1, 1], [], []>} : vector<8x10xf32>, vector<10x20xf32>, vector<8x20xf32> -> vector<8x20xf32>
    %9 = arith.addf %6, %8 : vector<8x20xf32>
    %10 = vector.broadcast %2 : vector<1x20xf32> to vector<8x20xf32>
    %11 = arith.addf %9, %10 : vector<8x20xf32>
    %cst_10 = arith.constant 0.000000e+00 : f32
    %12 = vector.broadcast %cst_10 : f32 to vector<8x20xf32>
    %13 = arith.maximumf %11, %12 : vector<8x20xf32>
    %cst_11 = arith.constant dense<0.000000e+00> : vector<8x128xf32>
    %14 = tpu.matmul %13, %3, %cst_11 {dimension_numbers = #tpu.dot_dimension_numbers<[1], [0], [0], [1], [0, 0, 1, 1], [], []>} : vector<8x20xf32>, vector<20x128xf32>, vector<8x128xf32> -> vector<8x128xf32>
    %15 = vector.broadcast %4 : vector<1x128xf32> to vector<8x128xf32>
    %16 = arith.addf %14, %15 : vector<8x128xf32>
    %c0_12 = arith.constant 0 : index
    %c0_13 = arith.constant 0 : index
    %17 = vector.load %arg3[%c0_12, %c0_13] : memref<8x128xf32, #tpu.memory_space<vmem>>, vector<8x128xf32>
    tpu.vector_store %arg3[%c0_12, %c0_13], %16 {strides = array<i32>} : memref<8x128xf32, #tpu.memory_space<vmem>>, vector<8x128xf32>,
    return
  }
}

</mosaic_0001>

<bundles_post_ra>
// kernel: dual_cifar4_forward.1
= control target key start
LH: loop header
LB: loop body
LE: loop exit
PB: predicated region body
PF: predicated region fallthrough
CT: control target
= control target key end

     0   :  { %8 = vsyncpa [#allocation3], 0  ;;  %s465_s0 = inlined_call_operand.hbm [shape: f32[8,10], index: 0, kind: input, shape index: {}]   ;;  %s466_s1 = inlined_call_operand.hbm [shape: f32[8,10], index: 1, kind: input, shape index: {}]   ;;  %s467_s2 = inlined_call_operand.hbm [shape: f32[72,128], index: 2, kind: input, shape index: {}]   ;;  %s468_s3 = inlined_call_operand.vmem [shape: f32[8,128], index: 3, kind: output, shape index: {}]  }
   0x1   :  { %9 = vsyncpa [#allocation5], 0  ;;  %s423_s12 = smov [#allocation4]   ;;  %s424_s14 = smov [#allocation2]  }
   0x2   :  { %s26_s13 = sshll.u32 %s423_s12, 4  ;;  %s16_s15 = sshll.u32 %s424_s14, 4  ;;  %s27_s13 = int_to_ptr.vmem [resolvable:$true] %s26_s13  ;;  %s17_s15 = int_to_ptr.vmem [resolvable:$true] %s16_s15 }
   0x3   :  { %s367_s16 = scalar_lea.vmem %s27_s13, 128  ;;  %p372_p1 = scmp.lt.s32.totalorder %s27_s13, %s27_s13 }
   0x4   :  { %p368_p0 = scmp.ne.s32.totalorder %s27_s13, %s367_s16  ;;  %p373_p2 = scmp.lt.s32.totalorder %s367_s16, %s367_s16 }
   0x6   :  { %p374_p3 = por %p373_p2, %p372_p1 }
   0x8   :  { %p375_p4 = pnand %p374_p3, %p368_p0 }
   0xa   :  { %378 = shalt.err (!%p375_p4)
}
   0xb   :  { %29 = dma.hbm_to_vmem [thread:$0]  %s466_s1, 128, %s27_s13, [#allocation5]  }
   0xc   :  { %s387_s19 = scalar_lea.vmem %s17_s15, 128  ;;  %p392_p6 = scmp.lt.s32.totalorder %s17_s15, %s17_s15 }
   0xd   :  { %p388_p5 = scmp.ne.s32.totalorder %s17_s15, %s387_s19  ;;  %p393_p7 = scmp.lt.s32.totalorder %s387_s19, %s387_s19 }
   0xf   :  { %p394_p8 = por %p393_p7, %p392_p6 }
  0x11   :  { %p395_p9 = pnand %p394_p8, %p388_p5 }
  0x13   :  { %398 = shalt.err (!%p395_p9)
}
  0x14   :  { %19 = dma.hbm_to_vmem [thread:$0]  %s465_s0, 128, %s17_s15, [#allocation3]  }
  0x15   :  { %s425_s22 = smov [#allocation6]  }
  0x16   :  { %s35_s23 = sshll.u32 %s425_s22, 4  ;;  %s36_s23 = int_to_ptr.vmem [resolvable:$true] %s35_s23 }
  0x17   :  { %s407_s24 = scalar_lea.vmem %s36_s23, 1152  ;;  %p412_p11 = scmp.lt.s32.totalorder %s36_s23, %s36_s23 }
  0x18   :  { %p408_p10 = scmp.ne.s32.totalorder %s36_s23, %s407_s24  ;;  %p413_p12 = scmp.lt.s32.totalorder %s407_s24, %s407_s24 }
  0x1a   :  { %p414_p13 = por %p413_p12, %p412_p11 }
  0x1c   :  { %p415_p0 = pnand %p414_p13, %p408_p10 }
  0x1e   :  { %418 = shalt.err (!%p415_p0)
}
  0x1f   :  { %s426_s1 = smov 128   ;;  %s427_s25 = smov 8  }
  0x20   :  { %41 = dma.hbm_to_vmem [thread:$0]  %s467_s2, 1152, %s36_s23, [#allocation5], %s426_s1, %s426_s1, %s427_s25  }
  0x21   :  { %419 = dma.done.wait [#allocation3], 128  }
  0x22   :  { %420 = vsyncadd [#allocation3], 4294967168 }
  0x23   :  { %421 = dma.done.wait [#allocation5], 1280  }
  0x24   :  { %422 = vsyncadd [#allocation5], 4294966016  ;;  %v428_v0 = vmov 0.0   ;;  %vm429_vm0 = vmmov 0   ;;  %vm66_vm1 = vcmask 1041408   ;;  %v53_v2 = vld [vmem:[#allocation6 + $0x10] sm:$0xff] }
  0x25   :  { %329 = vmatprep.subr.mxu1 %v428_v0  ;;  %333 = vmatprep.mubr.msk.f32.mxu1 %vm429_vm0, %v428_v0  ;;  %v54_v1 = vld [vmem:[#allocation6 + $0x18] sm:$0x3]  ;;  %vm62_vm2 = vcmask 80896   ;;  %v52_v4 = vld [vmem:[#allocation6 + $0x8] sm:$0x3]  ;;  %v51_v5 = vld [vmem:[#allocation6] sm:$0xff] }
  0x26   :  { %343 = vmatprep.subr.mxu0 %v428_v0  ;;  %349 = vmatprep.mubr.msk.f32.mxu0 %vm429_vm0, %v428_v0  ;;  %v61_v3 = vld [vmem:[#allocation4] sm:$0xff]  ;;  %v60_v6 = vld [vmem:[#allocation2] sm:$0xff]  ;;  %vm230_vm3 = vcmask 1043456   ;;  %v56_v9 = vld [vmem:[#allocation6 + $0x28] sm:$0xff]  ;;  %vm226_vm4 = vcmask 162816  }
  0x27   :  { %330 = vmatpush3.msk.msra.mxu1 %vm66_vm1, %v54_v1  ;;  %v58_v7 = vld [vmem:[#allocation6 + $0x38] sm:$0xf]  ;;  %v57_v8 = vld [vmem:[#allocation6 + $0x30] sm:$0xff]  ;;  %v315_v12 = vld [vmem:[#allocation6 + $0x20] ss:$0 sm:$0xff] }
  0x28   :  { %331 = vmatprep.subr.mxu1 %v428_v0  ;;  %344 = vmatpush3.msk.msra.mxu0 %vm230_vm3, %v58_v7  ;;  %v316_v18 = vld [vmem:[#allocation6 + $0x40] ss:$0 sm:$0xff] }
  0x29   :  { %332 = vmatpush3.msra.mxu1 %v53_v2  ;;  %345 = vmatprep.subr.mxu0 %v428_v0 }
  0x2a   :  { %334 = vmatmul.mubr.msk.f32.vlgmr.msra.gmra.mxu1 %vm62_vm2, %v61_v3  ;;  %336 = vmatprep.subr.mxu1 %v428_v0 }
  0x2b   :  { %337 = vmatpush3.msk.msra.mxu1 %vm66_vm1, %v52_v4  ;;  %340 = vmatprep.mubr.msk.f32.mxu1 %vm429_vm0, %v428_v0 }
  0x2c   :  { %338 = vmatprep.subr.mxu1 %v428_v0  ;;  %346 = vmatpush3.msra.mxu0 %v57_v8 }
  0x2d   :  { %339 = vmatpush3.msra.mxu1 %v51_v5  ;;  %347 = vmatprep.subr.mxu0 %v428_v0 }
  0x2e   :  { %341 = vmatmul.mubr.msk.f32.vlgmr.msra.gmra.mxu1 %vm62_vm2, %v60_v6  ;;  %348 = vmatpush3.msra.mxu0 %v56_v9 }
  0xea   :  { %v136_v10 = vpop.f32.mrf.mxu1 }
  0xec   :  { %v335_v11 = vpop.f32.mrf.mxu1 }
  0xee   :  { %v212_v13 = vpop.f32.mrf.mxu1 }
  0xef   :  { %v213_v14 = vadd.f32 %v212_v13, %v136_v10 }
  0xf0   :  { %v342_v15 = vpop.f32.mrf.mxu1 }
  0xf1   :  { %v220_v16 = vadd.f32 %v315_v12, %v213_v14 }
  0xf3   :  { %v221_v17 = vmax.f32 %v220_v16, 0.0 }
  0xf5   :  { %350 = vmatmul.mubr.msk.f32.vlgmr.msra.gmra.mxu0 %vm226_vm4, %v221_v17 }
 0x1b5   :  { %v300_v19 = vpop.f32.mrf.mxu0 }
 0x1b6   :  { %v301_v20 = vadd.f32 %v316_v18, %v300_v19 }
 0x1b7   :  { %v351_v21 = vpop.f32.mrf.mxu0 }
 0x1b8   :  { %304 = vst [vmem:[%s468_s3] sm:$0xff] %v301_v20 }
 0x1b9   :  { %309 = vsyncpa [#allocation3], 1 }
 0x1ba   :  { %310 = vsyncpa [#allocation5], 1 }

</bundles_post_ra>
